<compile_context>
chip_gen: v7x
topology: tpu7x:2x2x1
jax: 0.10.0
libtpu: 0.0.40
codegen_flags: <defaults>
</compile_context>

<pallas_src>
import jax
import jax.numpy as jnp
from jax.experimental import pallas as pl
from jax.experimental.pallas import tpu as pltpu

FS = 16          # padded feature width (sublane axis); real max width is 12
MAX_TILE = 1024  # batch (lane-axis) tile
NUM_LAYERS = 5
OUT_DIM = 2


def mlp_kernel(x_ref, w_ref, b_ref, o_ref):
    # x_ref: (FS, TILE_B)   w_ref: (5, FS, FS) holding W_l^T   b_ref: (5, FS, 1)
    # o_ref: (FS, TILE_B)
    h = x_ref[...]

    def dense(h, layer):
        # h_new = W^T @ h + b  (bias broadcasts along the batch/lane axis)
        return (jnp.dot(w_ref[layer], h, preferred_element_type=jnp.float32)
                + b_ref[layer])

    h = jnp.maximum(dense(h, 0), 0.0)
    h = jnp.maximum(dense(h, 1), 0.0)
    h = jnp.maximum(dense(h, 2), 0.0)
    # layer4 is used twice in the PyTorch forward: relu(l4(h)) + 0.01*l4(h)
    # -> compute once, fuse into one select+mul (exact).
    h4 = dense(h, 3)
    h = h4 * jnp.where(h4 > 0.0, 1.01, 0.01)
    o_ref[...] = dense(h, 4).astype(o_ref.dtype)


def _round_up(x, m):
    return ((x + m - 1) // m) * m


def pack_params(params):
    """One-time packing (init path, NOT per-call):
    weights -> [5, FS, FS] zero-padded W^T slabs, biases -> [5, FS, 1]."""
    w_packed = jnp.zeros((NUM_LAYERS, FS, FS), jnp.float32)
    b_packed = jnp.zeros((NUM_LAYERS, FS, 1), jnp.float32)
    for i, (w, b) in enumerate(params):
        fi, fo = w.shape
        w_packed = w_packed.at[i, :fo, :fi].set(w.T.astype(jnp.float32))
        b_packed = b_packed.at[i, :fo, 0].set(b.reshape(-1).astype(jnp.float32))
    return w_packed, b_packed


def _choose_tiling(batch):
    """Static (trace-time) tiling: lane tile is a multiple of 128, balanced across
    tiles, and split into >=2 grid steps when possible so v7x uses both TCs."""
    min_b = _round_up(max(batch, 1), 128)
    n_tiles = pl.cdiv(min_b, MAX_TILE)
    if n_tiles == 1 and min_b >= 256:
        n_tiles = 2
    tile_b = _round_up(pl.cdiv(batch, n_tiles), 128)
    return tile_b, tile_b * n_tiles, n_tiles


@jax.jit
def mlp_forward(x, w_packed, b_packed):
    """x: [batch, 2] float32 -> [batch, 2] float32."""
    batch, in_dim = x.shape
    tile_b, padded_batch, n_tiles = _choose_tiling(batch)

    # Transposed, zero-padded input slab [FS, padded_batch]; pad/transpose fuse
    # under jit. Padded feature rows and padded batch columns are numerically inert
    # (zero weight rows/cols, zero bias lanes; extra batch columns are sliced off).
    x_t = jnp.pad(x.astype(jnp.float32).T,
                  ((0, FS - in_dim), (0, padded_batch - batch)))

    out = pl.pallas_call(
        mlp_kernel,
        out_shape=jax.ShapeDtypeStruct((FS, padded_batch), jnp.float32),
        grid=(n_tiles,),
        in_specs=[
            pl.BlockSpec((FS, tile_b), lambda i: (0, i)),             # activations
            pl.BlockSpec((NUM_LAYERS, FS, FS), lambda i: (0, 0, 0)),  # resident W^T slab
            pl.BlockSpec((NUM_LAYERS, FS, 1), lambda i: (0, 0, 0)),   # resident bias slab
        ],
        out_specs=pl.BlockSpec((FS, tile_b), lambda i: (0, i)),
        compiler_params=pltpu.CompilerParams(
            dimension_semantics=("parallel",),
        ),
    )(x_t, w_packed, b_packed)

    return out[:OUT_DIM, :batch].T


def init_params(key):
    """Deterministic init matching nn.Linear shapes; w stored as [in, out]."""
    dims = [(2, 8), (8, 12), (12, 12), (12, 8), (8, 2)]
    params = []
    for fan_in, fan_out in dims:
        kw, kb, key = jax.random.split(key, 3)
        bound = 1.0 / (fan_in ** 0.5)
        w = jax.random.uniform(kw, (fan_in, fan_out), jnp.float32, -bound, bound)
        b = jax.random.uniform(kb, (1, fan_out), jnp.float32, -bound, bound)
        params.append((w, b))
    return params


def reference_forward(x, params):
    (w1, b1), (w2, b2), (w3, b3), (w4, b4), (w5, b5) = params
    h = jnp.maximum(x @ w1 + b1, 0.0)
    h = jnp.maximum(h @ w2 + b2, 0.0)
    h = jnp.maximum(h @ w3 + b3, 0.0)
    h4 = h @ w4 + b4
    h = jnp.maximum(h4, 0.0) + 0.01 * h4
    return h @ w5 + b5


if __name__ == "__main__":
    key = jax.random.PRNGKey(0)
    kx, kp = jax.random.split(key)
    params = init_params(kp)
    w_packed, b_packed = pack_params(params)   # one-time, hoisted out of the hot path

    # Small test (batch=8, in_features=2) — single grid step.
    x = jax.random.normal(kx, (8, 2), jnp.float32)
    out = jax.block_until_ready(mlp_forward(x, w_packed, b_packed))
    ref = reference_forward(x, params)
    assert out.shape == (8, 2)
    assert jnp.allclose(out, ref, atol=1e-5, rtol=1e-5), "mismatch vs JAX reference (batch=8)"

    # Larger, non-multiple batch — exercises multi-tile grid + padding slice-off.
    x2 = jax.random.normal(kx, (300, 2), jnp.float32)
    out2 = jax.block_until_ready(mlp_forward(x2, w_packed, b_packed))
    ref2 = reference_forward(x2, params)
    assert out2.shape == (300, 2)
    assert jnp.allclose(out2, ref2, atol=1e-5, rtol=1e-5), "mismatch vs JAX reference (batch=300)"

    print("KERNEL_OK")
</pallas_src>

<mosaic_0001>
module attributes {stable_mosaic.version = 11 : i64} {
  func.func @mlp_kernel(%arg0: i32, %arg1: memref<16x128xf32, #tpu.memory_space<vmem>>, %arg2: memref<5x16x16xf32, #tpu.memory_space<vmem>>, %arg3: memref<5x16x1xf32, #tpu.memory_space<vmem>>, %arg4: memref<16x128xf32, #tpu.memory_space<vmem>>) attributes {dimension_semantics = [#tpu.dimension_semantics<parallel>], iteration_bounds = array<i64: 1>, scalar_prefetch = 0 : i64, scratch_operands = 0 : i64, tpu.core_type = #tpu.core_type<tc>, window_params = [{transform_indices = @transform_0, window_bounds = array<i64: 16, 128>}, {pipeline_mode = #tpu.pipeline_mode<synchronous>, transform_indices = @transform_1, window_bounds = array<i64: 5, 16, 16>}, {pipeline_mode = #tpu.pipeline_mode<synchronous>, transform_indices = @transform_2, window_bounds = array<i64: 5, 16, 1>}, {transform_indices = @transform_3, window_bounds = array<i64: 16, 128>}]} {
    %c0 = arith.constant 0 : index
    %c0_0 = arith.constant 0 : index
    %0 = vector.load %arg1[%c0, %c0_0] : memref<16x128xf32, #tpu.memory_space<vmem>>, vector<16x128xf32>
    %c0_1 = arith.constant 0 : index
    %c0_2 = arith.constant 0 : index
    %c0_3 = arith.constant 0 : index
    %1 = vector.load %arg2[%c0_1, %c0_2, %c0_3] : memref<5x16x16xf32, #tpu.memory_space<vmem>>, vector<1x16x16xf32>
    %2 = vector.shape_cast %1 : vector<1x16x16xf32> to vector<16x16xf32>
    %cst = arith.constant dense<0.000000e+00> : vector<16x128xf32>
    %3 = tpu.matmul %2, %0, %cst {dimension_numbers = #tpu.dot_dimension_numbers<[1], [0], [0], [1], [0, 0, 1, 1], [], []>} : vector<16x16xf32>, vector<16x128xf32>, vector<16x128xf32> -> vector<16x128xf32>
    %c0_4 = arith.constant 0 : index
    %c0_5 = arith.constant 0 : index
    %c0_6 = arith.constant 0 : index
    %4 = vector.load %arg3[%c0_4, %c0_5, %c0_6] : memref<5x16x1xf32, #tpu.memory_space<vmem>>, vector<1x16x1xf32>
    %5 = vector.shape_cast %4 : vector<1x16x1xf32> to vector<16x1xf32>
    %6 = vector.broadcast %5 : vector<16x1xf32> to vector<16x128xf32>
    %7 = arith.addf %3, %6 : vector<16x128xf32>
    %cst_7 = arith.constant 0.000000e+00 : f32
    %8 = vector.broadcast %cst_7 : f32 to vector<16x128xf32>
    %9 = arith.maximumf %7, %8 : vector<16x128xf32>
    %c1 = arith.constant 1 : index
    %c0_8 = arith.constant 0 : index
    %c0_9 = arith.constant 0 : index
    %10 = vector.load %arg2[%c1, %c0_8, %c0_9] : memref<5x16x16xf32, #tpu.memory_space<vmem>>, vector<1x16x16xf32>
    %11 = vector.shape_cast %10 : vector<1x16x16xf32> to vector<16x16xf32>
    %cst_10 = arith.constant dense<0.000000e+00> : vector<16x128xf32>
    %12 = tpu.matmul %11, %9, %cst_10 {dimension_numbers = #tpu.dot_dimension_numbers<[1], [0], [0], [1], [0, 0, 1, 1], [], []>} : vector<16x16xf32>, vector<16x128xf32>, vector<16x128xf32> -> vector<16x128xf32>
    %c1_11 = arith.constant 1 : index
    %c0_12 = arith.constant 0 : index
    %c0_13 = arith.constant 0 : index
    %13 = vector.load %arg3[%c1_11, %c0_12, %c0_13] : memref<5x16x1xf32, #tpu.memory_space<vmem>>, vector<1x16x1xf32>
    %14 = vector.shape_cast %13 : vector<1x16x1xf32> to vector<16x1xf32>
    %15 = vector.broadcast %14 : vector<16x1xf32> to vector<16x128xf32>
    %16 = arith.addf %12, %15 : vector<16x128xf32>
    %cst_14 = arith.constant 0.000000e+00 : f32
    %17 = vector.broadcast %cst_14 : f32 to vector<16x128xf32>
    %18 = arith.maximumf %16, %17 : vector<16x128xf32>
    %c2 = arith.constant 2 : index
    %c0_15 = arith.constant 0 : index
    %c0_16 = arith.constant 0 : index
    %19 = vector.load %arg2[%c2, %c0_15, %c0_16] : memref<5x16x16xf32, #tpu.memory_space<vmem>>, vector<1x16x16xf32>
    %20 = vector.shape_cast %19 : vector<1x16x16xf32> to vector<16x16xf32>
    %cst_17 = arith.constant dense<0.000000e+00> : vector<16x128xf32>
    %21 = tpu.matmul %20, %18, %cst_17 {dimension_numbers = #tpu.dot_dimension_numbers<[1], [0], [0], [1], [0, 0, 1, 1], [], []>} : vector<16x16xf32>, vector<16x128xf32>, vector<16x128xf32> -> vector<16x128xf32>
    %c2_18 = arith.constant 2 : index
    %c0_19 = arith.constant 0 : index
    %c0_20 = arith.constant 0 : index
    %22 = vector.load %arg3[%c2_18, %c0_19, %c0_20] : memref<5x16x1xf32, #tpu.memory_space<vmem>>, vector<1x16x1xf32>
    %23 = vector.shape_cast %22 : vector<1x16x1xf32> to vector<16x1xf32>
    %24 = vector.broadcast %23 : vector<16x1xf32> to vector<16x128xf32>
    %25 = arith.addf %21, %24 : vector<16x128xf32>
    %cst_21 = arith.constant 0.000000e+00 : f32
    %26 = vector.broadcast %cst_21 : f32 to vector<16x128xf32>
    %27 = arith.maximumf %25, %26 : vector<16x128xf32>
    %c3 = arith.constant 3 : index
    %c0_22 = arith.constant 0 : index
    %c0_23 = arith.constant 0 : index
    %28 = vector.load %arg2[%c3, %c0_22, %c0_23] : memref<5x16x16xf32, #tpu.memory_space<vmem>>, vector<1x16x16xf32>
    %29 = vector.shape_cast %28 : vector<1x16x16xf32> to vector<16x16xf32>
    %cst_24 = arith.constant dense<0.000000e+00> : vector<16x128xf32>
    %30 = tpu.matmul %29, %27, %cst_24 {dimension_numbers = #tpu.dot_dimension_numbers<[1], [0], [0], [1], [0, 0, 1, 1], [], []>} : vector<16x16xf32>, vector<16x128xf32>, vector<16x128xf32> -> vector<16x128xf32>
    %c3_25 = arith.constant 3 : index
    %c0_26 = arith.constant 0 : index
    %c0_27 = arith.constant 0 : index
    %31 = vector.load %arg3[%c3_25, %c0_26, %c0_27] : memref<5x16x1xf32, #tpu.memory_space<vmem>>, vector<1x16x1xf32>
    %32 = vector.shape_cast %31 : vector<1x16x1xf32> to vector<16x1xf32>
    %33 = vector.broadcast %32 : vector<16x1xf32> to vector<16x128xf32>
    %34 = arith.addf %30, %33 : vector<16x128xf32>
    %cst_28 = arith.constant 0.000000e+00 : f32
    %35 = vector.broadcast %cst_28 : f32 to vector<16x128xf32>
    %36 = arith.cmpf ogt, %34, %35 : vector<16x128xf32>
    %cst_29 = arith.constant 1.010000e+00 : f32
    %cst_30 = arith.constant 0.00999999977 : f32
    %37 = vector.broadcast %cst_29 : f32 to vector<16x128xf32>
    %38 = vector.broadcast %cst_30 : f32 to vector<16x128xf32>
    %39 = arith.select %36, %37, %38 : vector<16x128xi1>, vector<16x128xf32>
    %40 = arith.mulf %34, %39 : vector<16x128xf32>
    %c4 = arith.constant 4 : index
    %c0_31 = arith.constant 0 : index
    %c0_32 = arith.constant 0 : index
    %41 = vector.load %arg2[%c4, %c0_31, %c0_32] : memref<5x16x16xf32, #tpu.memory_space<vmem>>, vector<1x16x16xf32>
    %42 = vector.shape_cast %41 : vector<1x16x16xf32> to vector<16x16xf32>
    %cst_33 = arith.constant dense<0.000000e+00> : vector<16x128xf32>
    %43 = tpu.matmul %42, %40, %cst_33 {dimension_numbers = #tpu.dot_dimension_numbers<[1], [0], [0], [1], [0, 0, 1, 1], [], []>} : vector<16x16xf32>, vector<16x128xf32>, vector<16x128xf32> -> vector<16x128xf32>
    %c4_34 = arith.constant 4 : index
    %c0_35 = arith.constant 0 : index
    %c0_36 = arith.constant 0 : index
    %44 = vector.load %arg3[%c4_34, %c0_35, %c0_36] : memref<5x16x1xf32, #tpu.memory_space<vmem>>, vector<1x16x1xf32>
    %45 = vector.shape_cast %44 : vector<1x16x1xf32> to vector<16x1xf32>
    %46 = vector.broadcast %45 : vector<16x1xf32> to vector<16x128xf32>
    %47 = arith.addf %43, %46 : vector<16x128xf32>
    %c0_37 = arith.constant 0 : index
    %c0_38 = arith.constant 0 : index
    %48 = vector.load %arg4[%c0_37, %c0_38] : memref<16x128xf32, #tpu.memory_space<vmem>>, vector<16x128xf32>
    tpu.vector_store %arg4[%c0_37, %c0_38], %47 {strides = array<i32>} : memref<16x128xf32, #tpu.memory_space<vmem>>, vector<16x128xf32>,
    return
  }
  func.func @transform_0(%arg0: i32) -> (i32, i32) {
    %c0_i32 = arith.constant 0 : i32
    %c0_i32_0 = arith.constant 0 : i32
    return %c0_i32, %arg0 : i32, i32
  }
  func.func @transform_1(%arg0: i32) -> (i32, i32, i32) {
    %c0_i32 = arith.constant 0 : i32
    %c0_i32_0 = arith.constant 0 : i32
    %c0_i32_1 = arith.constant 0 : i32
    %c0_i32_2 = arith.constant 0 : i32
    return %c0_i32, %c0_i32_0, %c0_i32_1 : i32, i32, i32
  }
  func.func @transform_2(%arg0: i32) -> (i32, i32, i32) {
    %c0_i32 = arith.constant 0 : i32
    %c0_i32_0 = arith.constant 0 : i32
    %c0_i32_1 = arith.constant 0 : i32
    %c0_i32_2 = arith.constant 0 : i32
    return %c0_i32, %c0_i32_0, %c0_i32_1 : i32, i32, i32
  }
  func.func @transform_3(%arg0: i32) -> (i32, i32) {
    %c0_i32 = arith.constant 0 : i32
    %c0_i32_0 = arith.constant 0 : i32
    return %c0_i32, %arg0 : i32, i32
  }
}

</mosaic_0001>

<bundles_post_ra>
// kernel: mlp_forward.1
= control target key start
LH: loop header
LB: loop body
LE: loop exit
PB: predicated region body
PF: predicated region fallthrough
CT: control target
= control target key end

     0   :  { %vm30_vm0 = vcmask 130048   ;;  %v623_v3 = vmov 0   ;;  %v624_v56 = vmov 0.01   ;;  %s727_s0 = inlined_call_operand.vmem [shape: f32[16,128], index: 0, kind: input, shape index: {}]   ;;  %s728_s1 = inlined_call_operand.vmem [shape: f32[5,16,16], index: 1, kind: input, shape index: {}]   ;;  %s729_s2 = inlined_call_operand.vmem [shape: f32[5,16,1], index: 2, kind: input, shape index: {}]   ;;  %s730_s3 = inlined_call_operand.vmem [shape: f32[16,128], index: 3, kind: output, shape index: {}]  }
   0x1   :  { %v14_v0 = vld [vmem:[%s727_s0] sm:$0xff]  ;;  %v15_v1 = vld [vmem:[%s727_s0 + $0x8] sm:$0xff]  ;;  %621 = vset.pattern.permute.xlu0 %v623_v3  ;;  %622 = vset.pattern.permute.xlu1 %v623_v3  ;;  %v534_v9 = vld [vmem:[%s729_s2 + $0x30] sm:$0xff] }
   0x2   :  { %v16_v2 = vld [vmem:[%s728_s1] sm:$0xff]  ;;  %v599_v4 = vpack.c.bf16 %v15_v1, %v14_v0  ;;  %v19_v6 = vld [vmem:[%s729_s2 + $0x8] sm:$0xff]  ;;  %v520_v11 = vld [vmem:[%s728_s1 + $0x10] sm:$0xff] }
   0x3   :  { %568 = vmatprep.mubr.msk.f32.mxu0 %vm30_vm0, %v16_v2  ;;  %v18_v5 = vld [vmem:[%s729_s2] sm:$0xff]  ;;  %v17_v7 = vld [vmem:[%s728_s1 + $0x8] sm:$0xff]  ;;  %575 = vmatprep.mubr.msk.f32.mxu1 %vm30_vm0, %v520_v11  ;;  %v522_v12 = vld [vmem:[%s729_s2 + $0x10] sm:$0xff] }
   0x4   :  { %22 = vperm.xlu0 %621, %v18_v5   ;;  %600 = vmatprep.subr.bf16.mxu0 %v599_v4  ;;  %v528_v8 = vld [vmem:[%s729_s2 + $0x20] sm:$0xff]  ;;  %v523_v13 = vld [vmem:[%s729_s2 + $0x18] sm:$0xff]  ;;  %v529_v14 = vld [vmem:[%s729_s2 + $0x28] sm:$0xff] }
   0x5   :  { %602 = vmatpush3.bf16.msra.mxu0 %v599_v4  ;;  %v540_v10 = vld [vmem:[%s729_s2 + $0x40] sm:$0xff]  ;;  %122 = vperm.xlu1 %622, %v522_v12   ;;  %v535_v15 = vld [vmem:[%s729_s2 + $0x38] sm:$0xff]  ;;  %v541_v16 = vld [vmem:[%s729_s2 + $0x48] sm:$0xff] }
   0x6   :  { %v521_v26 = vld [vmem:[%s728_s1 + $0x18] sm:$0xff]  ;;  %v526_v27 = vld [vmem:[%s728_s1 + $0x20] sm:$0xff]  ;;  %v527_v37 = vld [vmem:[%s728_s1 + $0x28] sm:$0xff] }
   0x7   :  { %v532_v38 = vld [vmem:[%s728_s1 + $0x30] sm:$0xff]  ;;  %v533_v48 = vld [vmem:[%s728_s1 + $0x38] sm:$0xff]  ;;  %v538_v49 = vld [vmem:[%s728_s1 + $0x40] sm:$0xff] }
   0x8   :  { %27 = vperm.xlu0 %621, %v19_v6   ;;  %569 = vmatmul.mubr.msk.f32.vlgmr.msra.gmra.mrb[0].mxu0 %vm30_vm0, %v17_v7  ;;  %v539_v62 = vld [vmem:[%s728_s1 + $0x48] sm:$0xff] }
   0x9   :  { %127 = vperm.xlu1 %622, %v523_v13   ;;  %582 = vmatprep.mubr.msk.f32.mxu0 %vm30_vm0, %v526_v27 }
   0xc   :  { %221 = vperm.xlu0 %621, %v528_v8  }
   0xd   :  { %226 = vperm.xlu1 %622, %v529_v14  }
  0x10   :  { %320 = vperm.xlu0 %621, %v534_v9  }
  0x11   :  { %325 = vperm.xlu1 %622, %v535_v15  }
  0x14   :  { %423 = vperm.xlu0 %621, %v540_v10  }
  0x15   :  { %428 = vperm.xlu1 %622, %v541_v16  }
  0x83   :  { %v23_v17 = vpop.permute.xlu0 %22 }
  0x84   :  { %v123_v28 = vpop.permute.xlu1 %122 }
  0x87   :  { %v28_v18 = vpop.permute.xlu0 %27 }
  0x88   :  { %v128_v29 = vpop.permute.xlu1 %127 }
  0x8b   :  { %v222_v41 = vpop.permute.xlu0 %221 }
  0x8c   :  { %v227_v39 = vpop.permute.xlu1 %226 }
  0x8f   :  { %v321_v52 = vpop.permute.xlu0 %320 }
  0x90   :  { %v326_v50 = vpop.permute.xlu1 %325 }
  0x93   :  { %v424_v1 = vpop.permute.xlu0 %423 }
  0x94   :  { %v429_v63 = vpop.permute.xlu1 %428 }
  0xdb   :  { %v570_v19 = vpop.f32.mrb[0].mxu0 }
  0xdc   :  { %v109_v20 = vadd.f32 %v570_v19, %v28_v18  ;;  %v103_v21 = vpop.f32.mrb[1].mxu0 }
  0xdd   :  { %v104_v22 = vadd.f32 %v103_v21, %v23_v17 }
  0xde   :  { %v113_v23 = vmax.f32 %v109_v20, 0.0 }
  0xdf   :  { %v112_v24 = vmax.f32 %v104_v22, 0.0 }
  0xe1   :  { %v603_v25 = vpack.c.bf16 %v113_v23, %v112_v24 }
  0xe3   :  { %604 = vmatprep.subr.bf16.mxu1 %v603_v25 }
  0xe4   :  { %606 = vmatpush3.bf16.msra.mxu1 %v603_v25 }
  0xe7   :  { %576 = vmatmul.mubr.msk.f32.vlgmr.msra.gmra.mrb[0].mxu1 %vm30_vm0, %v521_v26 }
  0xe8   :  { %589 = vmatprep.mubr.msk.f32.mxu1 %vm30_vm0, %v532_v38 }
 0x1ba   :  { %v577_v30 = vpop.f32.mrb[0].mxu1 }
 0x1bb   :  { %v208_v31 = vadd.f32 %v577_v30, %v128_v29  ;;  %v202_v32 = vpop.f32.mrb[1].mxu1 }
 0x1bc   :  { %v203_v33 = vadd.f32 %v202_v32, %v123_v28 }
 0x1bd   :  { %v212_v34 = vmax.f32 %v208_v31, 0.0 }
 0x1be   :  { %v211_v35 = vmax.f32 %v203_v33, 0.0 }
 0x1c0   :  { %v607_v36 = vpack.c.bf16 %v212_v34, %v211_v35 }
 0x1c2   :  { %608 = vmatprep.subr.bf16.mxu0 %v607_v36 }
 0x1c3   :  { %610 = vmatpush3.bf16.msra.mxu0 %v607_v36 }
 0x1c6   :  { %583 = vmatmul.mubr.msk.f32.vlgmr.msra.gmra.mrb[2].mxu0 %vm30_vm0, %v527_v37 }
 0x1c7   :  { %596 = vmatprep.mubr.msk.f32.mxu0 %vm30_vm0, %v538_v49 }
 0x299   :  { %v584_v40 = vpop.f32.mrb[2].mxu0 }
 0x29a   :  { %v307_v42 = vadd.f32 %v584_v40, %v227_v39  ;;  %v301_v43 = vpop.f32.mrb[3].mxu0 }
 0x29b   :  { %v302_v44 = vadd.f32 %v301_v43, %v222_v41 }
 0x29c   :  { %v311_v45 = vmax.f32 %v307_v42, 0.0 }
 0x29d   :  { %v310_v46 = vmax.f32 %v302_v44, 0.0 }
 0x29f   :  { %v611_v47 = vpack.c.bf16 %v311_v45, %v310_v46 }
 0x2a1   :  { %612 = vmatprep.subr.bf16.mxu1 %v611_v47 }
 0x2a2   :  { %614 = vmatpush3.bf16.msra.mxu1 %v611_v47 }
 0x2a5   :  { %590 = vmatmul.mubr.msk.f32.vlgmr.msra.gmra.mrb[2].mxu1 %vm30_vm0, %v533_v48 }
 0x378   :  { %v591_v51 = vpop.f32.mrb[2].mxu1 }
 0x379   :  { %v406_v53 = vadd.f32 %v591_v51, %v326_v50  ;;  %v400_v54 = vpop.f32.mrb[3].mxu1 }
 0x37a   :  { %v401_v55 = vadd.f32 %v400_v54, %v321_v52 }
 0x37b   :  { %vm410_vm1 = vcmp.gt.f32.partialorder %v406_v53, 0.0 }
 0x37c   :  { %v412_v57 = vsel %vm410_vm1, 1.01, %v624_v56  ;;  %vm409_vm2 = vcmp.gt.f32.partialorder %v401_v55, 0.0 }
 0x37d   :  { %v414_v58 = vmul.f32 %v412_v57, %v406_v53  ;;  %v411_v59 = vsel %vm409_vm2, 1.01, %v624_v56 }
 0x37e   :  { %v413_v60 = vmul.f32 %v411_v59, %v401_v55 }
 0x380   :  { %v615_v61 = vpack.c.bf16 %v414_v58, %v413_v60 }
 0x382   :  { %616 = vmatprep.subr.bf16.mxu0 %v615_v61 }
 0x383   :  { %618 = vmatpush3.bf16.msra.mxu0 %v615_v61 }
 0x386   :  { %597 = vmatmul.mubr.msk.f32.vlgmr.msra.gmra.mrb[4].mxu0 %vm30_vm0, %v539_v62 }
 0x459   :  { %v598_v0 = vpop.f32.mrb[4].mxu0 }
 0x45a   :  { %v509_v2 = vadd.f32 %v598_v0, %v429_v63  ;;  %v503_v3 = vpop.f32.mrb[5].mxu0 }
 0x45b   :  { %v504_v4 = vadd.f32 %v503_v3, %v424_v1 }
 0x45c   :  { %513 = vst [vmem:[%s730_s3 + $0x8] sm:$0xff] %v509_v2 }
 0x45d   :  { %512 = vst [vmem:[%s730_s3] sm:$0xff] %v504_v4 }

</bundles_post_ra>
